<compile_context>
chip_gen: v6e
topology: v6e:2x2x1
jax: 0.10.0
libtpu: 0.0.40
codegen_flags: <defaults>
</compile_context>

<pallas_src>
import jax
import jax.numpy as jnp
from jax.experimental import pallas as pl
from jax.experimental.pallas import tpu as pltpu

IN_F = 8      # fc1 in_features
HID = 16      # fc1 out_features / fc2 in_features
OUT_F = 1     # fc2 out_features
GROUP = 16    # batch elements packed per row (GROUP * IN_F = 128 lanes)

ROW_W = GROUP * IN_F      # 128  (packed x row width)
HID_W = GROUP * HID       # 256  (packed hidden row width)
OUT_W = GROUP * OUT_F     # 16   (packed output row width)


def mlp_kernel(x_ref, w1b_ref, b1b_ref, w2b_ref, b2_ref, o_ref):
    # x_ref:   (rows_tile, 128)  -- 16 batch elements per row, lane-dense
    # w1b_ref: (128, 256)        -- block-diag packed fc1 weight
    # b1b_ref: (1, 256)          -- packed fc1 bias
    # w2b_ref: (256, 16)         -- block-diag packed fc2 weight
    # b2_ref:  (1, 1)            -- fc2 bias
    # o_ref:   (rows_tile, 16)   -- 16 batch outputs per row
    h = jnp.dot(x_ref[...], w1b_ref[...], preferred_element_type=jnp.float32)
    h = jnp.maximum(h + b1b_ref[...], 0.0)
    y = jnp.dot(h, w2b_ref[...], preferred_element_type=jnp.float32) + b2_ref[...]
    o_ref[...] = y.astype(o_ref.dtype)


def mlp_forward(x, w1, b1, w2, b2, *, max_rows_tile=4096):
    """Forward pass of the 8->16->1 MLP (matches the PyTorch module).

    x:  (B, 8) float32
    w1: (16, 8)  fc1.weight (PyTorch (out, in) layout)
    b1: (16,)    fc1.bias
    w2: (1, 16)  fc2.weight
    b2: (1,)     fc2.bias
    returns (B, 1) float32
    """
    batch = x.shape[0]
    x = x.astype(jnp.float32)
    w1 = w1.astype(jnp.float32)
    b1 = b1.astype(jnp.float32)
    w2 = w2.astype(jnp.float32)
    b2 = b2.astype(jnp.float32)

    # ---- choose tiling: bounded tile, pad batch to a tile multiple ----------
    rows = pl.cdiv(batch, GROUP)
    if rows <= max_rows_tile:
        rows_tile = rows                      # single grid step; block == full dim
        rows_padded = rows
    else:
        rows_tile = max_rows_tile             # multiple of 8 -> always legal
        rows_padded = pl.cdiv(rows, rows_tile) * rows_tile
    batch_padded = rows_padded * GROUP
    if batch_padded != batch:
        x = jnp.pad(x, ((0, batch_padded - batch), (0, 0)))

    # Free contiguous reshape: (B_pad, 8) -> (B_pad/16, 128); no HBM traffic.
    x2 = x.reshape(rows_padded, ROW_W)

    # ---- pack weights (tiny, one-time) --------------------------------------
    eye_g = jnp.eye(GROUP, dtype=jnp.float32)
    # W1_big[g*8 + f, g*16 + k] = w1[k, f]
    w1_big = jnp.einsum("gh,kf->gfhk", eye_g, w1).reshape(ROW_W, HID_W)
    b1_big = jnp.tile(b1, GROUP).reshape(1, HID_W)
    # W2_big[g*16 + k, g] = w2[0, k]
    w2_big = jnp.einsum("gh,k->gkh", eye_g, w2.reshape(HID)).reshape(HID_W, OUT_W)
    b2_arr = b2.reshape(1, 1)

    grid = (rows_padded // rows_tile,)

    cost = pl.CostEstimate(
        flops=2 * rows_padded * ROW_W * HID_W          # packed fc1 matmul
        + 2 * rows_padded * HID_W * OUT_W              # packed fc2 matmul
        + 3 * rows_padded * HID_W,                     # bias + relu
        transcendentals=0,
        bytes_accessed=4 * (rows_padded * ROW_W + ROW_W * HID_W + HID_W
                            + HID_W * OUT_W + 1 + rows_padded * OUT_W),
    )

    out2d = pl.pallas_call(
        mlp_kernel,
        out_shape=jax.ShapeDtypeStruct((rows_padded, OUT_W), jnp.float32),
        grid=grid,
        in_specs=[
            pl.BlockSpec((rows_tile, ROW_W), lambda i: (i, 0)),   # packed x tiles
            pl.BlockSpec((ROW_W, HID_W), lambda i: (0, 0)),       # W1_big pinned
            pl.BlockSpec((1, HID_W), lambda i: (0, 0)),           # b1_big pinned
            pl.BlockSpec((HID_W, OUT_W), lambda i: (0, 0)),       # W2_big pinned
            pl.BlockSpec((1, 1), lambda i: (0, 0)),               # b2 pinned
        ],
        out_specs=pl.BlockSpec((rows_tile, OUT_W), lambda i: (i, 0)),
        compiler_params=pltpu.CompilerParams(
            dimension_semantics=("parallel",),   # batch-tile axis -> both TCs on v7x
        ),
        cost_estimate=cost,
    )(x2, w1_big, b1_big, w2_big, b2_arr)

    # Row-major flatten of (rows, 16) is exactly batch order -> free reshape.
    out = out2d.reshape(batch_padded, OUT_F)
    if batch_padded != batch:
        out = out[:batch]
    return out


if __name__ == "__main__":
    BATCH = 256  # small demo batch (16 packed rows, single grid step)

    key = jax.random.PRNGKey(0)
    k_x, k_w1, k_b1, k_w2, k_b2 = jax.random.split(key, 5)

    # Deterministic inputs / PyTorch-style uniform init bounds (fixed seed).
    x = jax.random.normal(k_x, (BATCH, IN_F), dtype=jnp.float32)
    lim1 = 1.0 / (IN_F ** 0.5)
    w1 = jax.random.uniform(k_w1, (HID, IN_F), jnp.float32, -lim1, lim1)
    b1 = jax.random.uniform(k_b1, (HID,), jnp.float32, -lim1, lim1)
    lim2 = 1.0 / (HID ** 0.5)
    w2 = jax.random.uniform(k_w2, (OUT_F, HID), jnp.float32, -lim2, lim2)
    b2 = jax.random.uniform(k_b2, (OUT_F,), jnp.float32, -lim2, lim2)

    out = mlp_forward(x, w1, b1, w2, b2)
    jax.block_until_ready(out)

    # Reference (same math as the PyTorch forward, PyTorch weight layout).
    ref = jnp.maximum(x @ w1.T + b1, 0.0) @ w2.T + b2
    assert out.shape == (BATCH, OUT_F)
    assert jnp.allclose(out, ref, atol=1e-4, rtol=1e-4), "mismatch vs reference"

    print("KERNEL_OK")
</pallas_src>

<mosaic_0001>
module attributes {stable_mosaic.version = 11 : i64} {
  func.func @mlp_kernel(%arg0: i32, %arg1: memref<16x128xf32, #tpu.memory_space<vmem>>, %arg2: memref<128x256xf32, #tpu.memory_space<vmem>>, %arg3: memref<1x256xf32, #tpu.memory_space<vmem>>, %arg4: memref<256x16xf32, #tpu.memory_space<vmem>>, %arg5: memref<1x1xf32, #tpu.memory_space<vmem>>, %arg6: memref<16x16xf32, #tpu.memory_space<vmem>>) attributes {dimension_semantics = [#tpu.dimension_semantics<parallel>], iteration_bounds = array<i64: 1>, scalar_prefetch = 0 : i64, scratch_operands = 0 : i64, tpu.core_type = #tpu.core_type<tc>, window_params = [{transform_indices = @transform_0, window_bounds = array<i64: 16, 128>}, {pipeline_mode = #tpu.pipeline_mode<synchronous>, transform_indices = @transform_1, window_bounds = array<i64: 128, 256>}, {pipeline_mode = #tpu.pipeline_mode<synchronous>, transform_indices = @transform_2, window_bounds = array<i64: 1, 256>}, {pipeline_mode = #tpu.pipeline_mode<synchronous>, transform_indices = @transform_3, window_bounds = array<i64: 256, 16>}, {pipeline_mode = #tpu.pipeline_mode<synchronous>, transform_indices = @transform_4, window_bounds = array<i64: 1, 1>}, {transform_indices = @transform_5, window_bounds = array<i64: 16, 16>}]} {
    %c0 = arith.constant 0 : index
    %c0_0 = arith.constant 0 : index
    %0 = vector.load %arg1[%c0, %c0_0] : memref<16x128xf32, #tpu.memory_space<vmem>>, vector<16x128xf32>
    %c0_1 = arith.constant 0 : index
    %c0_2 = arith.constant 0 : index
    %1 = vector.load %arg2[%c0_1, %c0_2] : memref<128x256xf32, #tpu.memory_space<vmem>>, vector<128x256xf32>
    %cst = arith.constant dense<0.000000e+00> : vector<16x256xf32>
    %2 = tpu.matmul %0, %1, %cst {dimension_numbers = #tpu.dot_dimension_numbers<[1], [0], [0], [1], [0, 0, 1, 1], [], []>} : vector<16x128xf32>, vector<128x256xf32>, vector<16x256xf32> -> vector<16x256xf32>
    %c0_3 = arith.constant 0 : index
    %c0_4 = arith.constant 0 : index
    %3 = vector.load %arg3[%c0_3, %c0_4] : memref<1x256xf32, #tpu.memory_space<vmem>>, vector<1x256xf32>
    %4 = vector.broadcast %3 : vector<1x256xf32> to vector<16x256xf32>
    %5 = arith.addf %2, %4 : vector<16x256xf32>
    %cst_5 = arith.constant 0.000000e+00 : f32
    %6 = vector.broadcast %cst_5 : f32 to vector<16x256xf32>
    %7 = arith.maximumf %5, %6 : vector<16x256xf32>
    %c0_6 = arith.constant 0 : index
    %c0_7 = arith.constant 0 : index
    %8 = vector.load %arg4[%c0_6, %c0_7] : memref<256x16xf32, #tpu.memory_space<vmem>>, vector<256x16xf32>
    %cst_8 = arith.constant dense<0.000000e+00> : vector<16x16xf32>
    %9 = tpu.matmul %7, %8, %cst_8 {dimension_numbers = #tpu.dot_dimension_numbers<[1], [0], [0], [1], [0, 0, 1, 1], [], []>} : vector<16x256xf32>, vector<256x16xf32>, vector<16x16xf32> -> vector<16x16xf32>
    %c0_9 = arith.constant 0 : index
    %c0_10 = arith.constant 0 : index
    %10 = vector.load %arg5[%c0_9, %c0_10] : memref<1x1xf32, #tpu.memory_space<vmem>>, vector<1x1xf32>
    %11 = vector.broadcast %10 : vector<1x1xf32> to vector<16x16xf32>
    %12 = arith.addf %9, %11 : vector<16x16xf32>
    %c0_11 = arith.constant 0 : index
    %c0_12 = arith.constant 0 : index
    %13 = vector.load %arg6[%c0_11, %c0_12] : memref<16x16xf32, #tpu.memory_space<vmem>>, vector<16x16xf32>
    tpu.vector_store %arg6[%c0_11, %c0_12], %12 {strides = array<i32>} : memref<16x16xf32, #tpu.memory_space<vmem>>, vector<16x16xf32>,
    return
  }
  func.func @transform_0(%arg0: i32) -> (i32, i32) {
    %c0_i32 = arith.constant 0 : i32
    %c0_i32_0 = arith.constant 0 : i32
    return %arg0, %c0_i32 : i32, i32
  }
  func.func @transform_1(%arg0: i32) -> (i32, i32) {
    %c0_i32 = arith.constant 0 : i32
    %c0_i32_0 = arith.constant 0 : i32
    %c0_i32_1 = arith.constant 0 : i32
    return %c0_i32, %c0_i32_0 : i32, i32
  }
  func.func @transform_2(%arg0: i32) -> (i32, i32) {
    %c0_i32 = arith.constant 0 : i32
    %c0_i32_0 = arith.constant 0 : i32
    %c0_i32_1 = arith.constant 0 : i32
    return %c0_i32, %c0_i32_0 : i32, i32
  }
  func.func @transform_3(%arg0: i32) -> (i32, i32) {
    %c0_i32 = arith.constant 0 : i32
    %c0_i32_0 = arith.constant 0 : i32
    %c0_i32_1 = arith.constant 0 : i32
    return %c0_i32, %c0_i32_0 : i32, i32
  }
  func.func @transform_4(%arg0: i32) -> (i32, i32) {
    %c0_i32 = arith.constant 0 : i32
    %c0_i32_0 = arith.constant 0 : i32
    %c0_i32_1 = arith.constant 0 : i32
    return %c0_i32, %c0_i32_0 : i32, i32
  }
  func.func @transform_5(%arg0: i32) -> (i32, i32) {
    %c0_i32 = arith.constant 0 : i32
    %c0_i32_0 = arith.constant 0 : i32
    return %arg0, %c0_i32 : i32, i32
  }
}

</mosaic_0001>

<bundles_post_ra>
// kernel: tpu_custom_call.1
= control target key start
LH: loop header
LB: loop body
LE: loop exit
PB: predicated region body
PF: predicated region fallthrough
CT: control target
= control target key end

     0   :  { %s597_s0 = inlined_call_operand.vmem [shape: f32[16,128], index: 0, kind: input, shape index: {}]   ;;  %s598_s1 = inlined_call_operand.vmem [shape: f32[128,256], index: 1, kind: input, shape index: {}]   ;;  %s599_s2 = inlined_call_operand.vmem [shape: f32[1,256], index: 2, kind: input, shape index: {}]   ;;  %s600_s3 = inlined_call_operand.vmem [shape: f32[256,16], index: 3, kind: input, shape index: {}]   ;;  %s601_s4 = inlined_call_operand.<no memory space> [shape: f32[1,1], index: 4, kind: input, shape index: {}]   ;;  %s602_s5 = inlined_call_operand.hbm [shape: f32[16,16], index: 5, kind: output, shape index: {}]  }
   0x1   :  { %v10_v0 = vstv %s601_s4 }
   0x2   :  { %11 = vst [vmem:[#allocation2] sm:$0x1] %v10_v0 }
   0x3   :  { %v56_v1 = vld [vmem:[%s598_s1 + $0xf8] sm:$0xff]  ;;  %v55_v2 = vld [vmem:[%s598_s1 + $0xf0] sm:$0xff]  ;;  %v54_v3 = vld [vmem:[%s598_s1 + $0xe8] sm:$0xff]  ;;  %v353_v5 = vmov 0.0  }
   0x4   :  { %69 = vmatprep.subr.mxu0 %v56_v1  ;;  %v53_v4 = vld [vmem:[%s598_s1 + $0xe0] sm:$0xff]  ;;  %133 = vmatprep.mubr.f32.mxu0 %v353_v5  ;;  %v52_v6 = vld [vmem:[%s598_s1 + $0xd8] sm:$0xff]  ;;  %v51_v7 = vld [vmem:[%s598_s1 + $0xd0] sm:$0xff] }
   0x5   :  { %70 = vmatpush1.msra.mxu0 %v55_v2  ;;  %v50_v8 = vld [vmem:[%s598_s1 + $0xc8] sm:$0xff]  ;;  %v49_v9 = vld [vmem:[%s598_s1 + $0xc0] sm:$0xff]  ;;  %v48_v10 = vld [vmem:[%s598_s1 + $0xb8] sm:$0xff] }
   0x6   :  { %71 = vmatprep.subr.mxu0 %v54_v3  ;;  %v47_v11 = vld [vmem:[%s598_s1 + $0xb0] sm:$0xff]  ;;  %v46_v12 = vld [vmem:[%s598_s1 + $0xa8] sm:$0xff]  ;;  %v45_v13 = vld [vmem:[%s598_s1 + $0xa0] sm:$0xff] }
   0x7   :  { %72 = vmatpush1.msra.mxu0 %v53_v4  ;;  %v44_v14 = vld [vmem:[%s598_s1 + $0x98] sm:$0xff]  ;;  %v43_v15 = vld [vmem:[%s598_s1 + $0x90] sm:$0xff]  ;;  %v42_v18 = vld [vmem:[%s598_s1 + $0x88] sm:$0xff] }
   0x8   :  { %73 = vmatprep.subr.mxu0 %v52_v6  ;;  %v181_v16 = vld [vmem:[%s600_s3 + $0xf8] sm:$0xff]  ;;  %v180_v19 = vld [vmem:[%s600_s3 + $0xf0] sm:$0xff]  ;;  %v41_v21 = vld [vmem:[%s598_s1 + $0x80] sm:$0xff] }
   0x9   :  { %74 = vmatpush1.msra.mxu0 %v51_v7  ;;  %v165_v17 = vld [vmem:[%s600_s3 + $0x78] sm:$0xff]  ;;  %287 = vmatprep.subr.mxu1 %v181_v16  ;;  %v164_v20 = vld [vmem:[%s600_s3 + $0x70] sm:$0xff]  ;;  %v179_v22 = vld [vmem:[%s600_s3 + $0xe8] sm:$0xff] }
   0xa   :  { %75 = vmatprep.subr.mxu0 %v50_v8  ;;  %288 = vmatpush3.msra.mxu1 %v165_v17  ;;  %v40_v23 = vld [vmem:[%s598_s1 + $0x78] sm:$0xff]  ;;  %v163_v24 = vld [vmem:[%s600_s3 + $0x68] sm:$0xff]  ;;  %v39_v25 = vld [vmem:[%s598_s1 + $0x70] sm:$0xff] }
   0xb   :  { %76 = vmatpush1.msra.mxu0 %v49_v9  ;;  %289 = vmatprep.subr.mxu1 %v180_v19  ;;  %v178_v26 = vld [vmem:[%s600_s3 + $0xe0] sm:$0xff]  ;;  %v38_v27 = vld [vmem:[%s598_s1 + $0x68] sm:$0xff]  ;;  %v177_v30 = vld [vmem:[%s600_s3 + $0xd8] sm:$0xff] }
   0xc   :  { %77 = vmatprep.subr.mxu0 %v48_v10  ;;  %290 = vmatpush3.msra.mxu1 %v164_v20  ;;  %v162_v28 = vld [vmem:[%s600_s3 + $0x60] sm:$0xff]  ;;  %v36_v31 = vld [vmem:[%s598_s1 + $0x58] sm:$0xff]  ;;  %v35_v33 = vld [vmem:[%s598_s1 + $0x50] sm:$0xff] }
   0xd   :  { %78 = vmatpush1.msra.mxu0 %v47_v11  ;;  %291 = vmatprep.subr.mxu1 %v179_v22  ;;  %v37_v29 = vld [vmem:[%s598_s1 + $0x60] sm:$0xff]  ;;  %v161_v32 = vld [vmem:[%s600_s3 + $0x58] sm:$0xff]  ;;  %v176_v34 = vld [vmem:[%s600_s3 + $0xd0] sm:$0xff] }
   0xe   :  { %79 = vmatprep.subr.mxu0 %v46_v12  ;;  %292 = vmatpush3.msra.mxu1 %v163_v24 }
   0xf   :  { %80 = vmatpush1.msra.mxu0 %v45_v13  ;;  %293 = vmatprep.subr.mxu1 %v178_v26 }
  0x10   :  { %81 = vmatprep.subr.mxu0 %v44_v14  ;;  %294 = vmatpush3.msra.mxu1 %v162_v28 }
  0x11   :  { %82 = vmatpush1.msra.mxu0 %v43_v15 }
  0x12   :  { %83 = vmatprep.subr.mxu0 %v42_v18 }
  0x13   :  { %84 = vmatpush1.msra.mxu0 %v41_v21 }
  0x14   :  { %85 = vmatprep.subr.mxu0 %v40_v23 }
  0x15   :  { %86 = vmatpush1.msra.mxu0 %v39_v25 }
  0x16   :  { %87 = vmatprep.subr.mxu0 %v38_v27 }
  0x17   :  { %12 = vsyncpa [#allocation4], 0  ;;  %88 = vmatpush1.msra.mxu0 %v37_v29  ;;  %v34_v35 = vld [vmem:[%s598_s1 + $0x48] sm:$0xff]  ;;  %295 = vmatprep.subr.mxu1 %v177_v30  ;;  %v160_v36 = vld [vmem:[%s600_s3 + $0x50] sm:$0xff]  ;;  %v59_v6 = vlaneseq  ;;  %vm267_vm0 = vcmask 130048  }
  0x18   :  { %89 = vmatprep.subr.mxu0 %v36_v31  ;;  %v33_v37 = vld [vmem:[%s598_s1 + $0x40] sm:$0xff]  ;;  %296 = vmatpush3.msra.mxu1 %v161_v32  ;;  %v175_v38 = vld [vmem:[%s600_s3 + $0xc8] sm:$0xff]  ;;  %v32_v39 = vld [vmem:[%s598_s1 + $0x38] sm:$0xff] }
  0x19   :  { %90 = vmatpush1.msra.mxu0 %v35_v33  ;;  %297 = vmatprep.subr.mxu1 %v176_v34  ;;  %v159_v40 = vld [vmem:[%s600_s3 + $0x48] sm:$0xff]  ;;  %v31_v41 = vld [vmem:[%s598_s1 + $0x30] sm:$0xff]  ;;  %v174_v42 = vld [vmem:[%s600_s3 + $0xc0] sm:$0xff]  ;;  %v60_v7 = vshrl.u32 %v59_v6, 7 }
  0x1a   :  { %91 = vmatprep.subr.mxu0 %v34_v35  ;;  %298 = vmatpush3.msra.mxu1 %v160_v36  ;;  %v30_v43 = vld [vmem:[%s598_s1 + $0x28] sm:$0xff]  ;;  %v158_v44 = vld [vmem:[%s600_s3 + $0x40] sm:$0xff]  ;;  %v173_v46 = vld [vmem:[%s600_s3 + $0xb8] sm:$0xff] }
  0x1b   :  { %92 = vmatpush1.msra.mxu0 %v33_v37  ;;  %299 = vmatprep.subr.mxu1 %v175_v38  ;;  %v29_v45 = vld [vmem:[%s598_s1 + $0x20] sm:$0xff]  ;;  %v28_v47 = vld [vmem:[%s598_s1 + $0x18] sm:$0xff]  ;;  %v27_v49 = vld [vmem:[%s598_s1 + $0x10] sm:$0xff]  ;;  %v61_v8 = vsub.s32 0, %v60_v7  ;;  %v65_v10 = vsub.s32 1, %v60_v7 }
  0x1c   :  { %93 = vmatprep.subr.mxu0 %v32_v39  ;;  %300 = vmatpush3.msra.mxu1 %v159_v40  ;;  %v157_v48 = vld [vmem:[%s600_s3 + $0x38] sm:$0xff]  ;;  %v172_v50 = vld [vmem:[%s600_s3 + $0xb0] sm:$0xff]  ;;  %v26_v51 = vld [vmem:[%s598_s1 + $0x8] sm:$0xff] }
  0x1d   :  { %94 = vmatpush1.msra.mxu0 %v31_v41  ;;  %301 = vmatprep.subr.mxu1 %v174_v42  ;;  %v156_v52 = vld [vmem:[%s600_s3 + $0x30] sm:$0xff]  ;;  %v25_v53 = vld [vmem:[%s598_s1] sm:$0xff]  ;;  %v171_v54 = vld [vmem:[%s600_s3 + $0xa8] sm:$0xff] }
  0x1e   :  { %95 = vmatprep.subr.mxu0 %v30_v43  ;;  %302 = vmatpush3.msra.mxu1 %v158_v44  ;;  %v23_v55 = vld [vmem:[%s597_s0] sm:$0xff]  ;;  %v155_v56 = vld [vmem:[%s600_s3 + $0x28] sm:$0xff]  ;;  %v169_v60 = vld [vmem:[%s600_s3 + $0x98] sm:$0xff] }
  0x1f   :  { %96 = vmatpush1.msra.mxu0 %v29_v45  ;;  %303 = vmatprep.subr.mxu1 %v173_v46  ;;  %v170_v57 = vld [vmem:[%s600_s3 + $0xa0] sm:$0xff]  ;;  %v24_v59 = vld [vmem:[%s597_s0 + $0x8] sm:$0xff]  ;;  %v153_v61 = vld [vmem:[%s600_s3 + $0x18] sm:$0xff] }
  0x20   :  { %97 = vmatprep.subr.mxu0 %v28_v47  ;;  %304 = vmatpush3.msra.mxu1 %v157_v48  ;;  %v154_v58 = vld [vmem:[%s600_s3 + $0x20] sm:$0xff]  ;;  %v168_v62 = vld [vmem:[%s600_s3 + $0x90] sm:$0xff]  ;;  %v167_v0 = vld [vmem:[%s600_s3 + $0x88] sm:$0xff] }
  0x21   :  { %98 = vmatpush1.msra.mxu0 %v27_v49  ;;  %305 = vmatprep.subr.mxu1 %v172_v50  ;;  %v152_v63 = vld [vmem:[%s600_s3 + $0x10] sm:$0xff]  ;;  %v151_v1 = vld [vmem:[%s600_s3 + $0x8] sm:$0xff]  ;;  %v166_v2 = vld [vmem:[%s600_s3 + $0x80] sm:$0xff] }
  0x22   :  { %99 = vmatprep.subr.mxu0 %v26_v51  ;;  %306 = vmatpush3.msra.mxu1 %v156_v52  ;;  %v150_v3 = vld [vmem:[%s600_s3] sm:$0xff] }
  0x23   :  { %100 = vmatpush1.msra.mxu0 %v25_v53  ;;  %307 = vmatprep.subr.mxu1 %v171_v54  ;;  %v286_v4 = vld [vmem:[#allocation2] ss:$0 sm:$0xff] }
  0x24   :  { %134 = vmatmul.mubr.f32.vlgmr.msra.gmra.mxu0 %v23_v55  ;;  %308 = vmatpush3.msra.mxu1 %v155_v56  ;;  %v57_v9 = vld [vmem:[%s599_s2] sm:$0x3]  ;;  %s355_s2 = smov [#allocation3]  }
  0x25   :  { %139 = vmatprep.mubr.f32.mxu0 %v353_v5  ;;  %309 = vmatprep.subr.mxu1 %v170_v57  ;;  %v354_v5 = vmov 0   ;;  %v62_v11 = vrot.slane %v57_v9, %v61_v8  ;;  %v66_v12 = vrot.slane %v57_v9, %v65_v10  ;;  %s275_s3 = sshll.u32 %s355_s2, 4  ;;  %s276_s3 = int_to_ptr.vmem [resolvable:$true] %s275_s3 }
  0x26   :  { %310 = vmatpush3.msra.mxu1 %v154_v58  ;;  %330 = vset.pattern.permute.xlu0 %v354_v5  ;;  %s331_s22 = scalar_lea.vmem %s276_s3, 256  ;;  %p336_p1 = scmp.lt.s32.totalorder %s276_s3, %s276_s3 }
  0x27   :  { %311 = vmatprep.subr.mxu1 %v169_v60  ;;  %189 = vperm.xlu0 %330, %v286_v4   ;;  %p332_p0 = scmp.ne.s32.totalorder %s276_s3, %s331_s22  ;;  %p337_p2 = scmp.lt.s32.totalorder %s331_s22, %s331_s22 }
  0x28   :  { %140 = vmatmul.mubr.f32.gmra.mxu0 %v24_v59  ;;  %312 = vmatpush3.msra.mxu1 %v153_v61 }
  0x29   :  { %313 = vmatprep.subr.mxu1 %v168_v62  ;;  %p338_p3 = por %p337_p2, %p336_p1 }
  0x2a   :  { %314 = vmatpush3.msra.mxu1 %v152_v63 }
  0x2b   :  { %315 = vmatprep.subr.mxu1 %v167_v0  ;;  %p339_p4 = pnand %p338_p3, %p332_p0 }
  0x2c   :  { %316 = vmatpush3.msra.mxu1 %v151_v1 }
  0x2d   :  { %317 = vmatprep.subr.mxu1 %v166_v2 }
  0x2e   :  { %318 = vmatpush3.msra.mxu1 %v150_v3 }
  0xa2   :  { %v190_v27 = vpop.permute.xlu0 %189 }
  0xe4   :  { %v135_v13 = vpop.f32.mrf.mxu0 }
  0xe5   :  { %v136_v14 = vadd.f32 %v135_v13, %v62_v11 }
  0xe6   :  { %v137_v15 = vpop.f32.mrf.mxu0 }
  0xe7   :  { %v138_v16 = vadd.f32 %v137_v15, %v66_v12  ;;  %v146_v19 = vmax.f32 %v136_v14, 0.0 }
  0xe8   :  { %v141_v17 = vpop.f32.mrf.mxu0 }
  0xe9   :  { %v147_v18 = vmax.f32 %v138_v16, 0.0  ;;  %v142_v20 = vadd.f32 %v141_v17, %v62_v11 }
  0xea   :  { %v143_v21 = vpop.f32.mrf.mxu0 }
  0xeb   :  { %v144_v22 = vadd.f32 %v143_v21, %v66_v12  ;;  %256 = vmatprep.mubr.f32.mxu1 %v147_v18  ;;  %v148_v24 = vmax.f32 %v142_v20, 0.0 }
  0xec   :  { %257 = vmatmul.mubr.f32.vlgmr.msra.gmra.mxu1 %v146_v19 }
  0xed   :  { %v149_v23 = vmax.f32 %v144_v22, 0.0 }
  0xef   :  { %261 = vmatprep.mubr.f32.mxu1 %v149_v23 }
  0xf0   :  { %262 = vmatmul.mubr.f32.gmra.mxu1 %v148_v24 }
 0x1ac   :  { %v319_v25 = vpop.f32.mrf.mxu1 }
 0x1ae   :  { %v320_v26 = vpop.f32.mrf.mxu1 }
 0x1af   :  { %v321_v28 = vadd.f32 %v320_v26, %v319_v25 }
 0x1b0   :  { %v322_v29 = vpop.f32.mrf.mxu1 }
 0x1b1   :  { %v259_v30 = vadd.f32 %v321_v28, %v190_v27 }
 0x1b2   :  { %v323_v31 = vpop.f32.mrf.mxu1 }
 0x1b3   :  { %268 = vst.msk [vmem:[#allocation3] sm:$0xff] %vm267_vm0, %v259_v30  ;;  %v324_v32 = vadd.f32 %v323_v31, %v322_v29 }
 0x1b5   :  { %v264_v33 = vadd.f32 %v324_v32, %v190_v27 }
 0x1b7   :  { %269 = vst.msk [vmem:[#allocation3 + $0x8] sm:$0xff] %vm267_vm0, %v264_v33 }
 0x1b8   :  { %342 = shalt.err (!%p339_p4)
}
 0x1b9   :  { %s356_s23 = smov 128   ;;  %s357_s24 = smov 8  }
 0x1ba   :  { %281 = dma.vmem_to_hbm [thread:$0]  %s276_s3, 256, %s602_s5, [#allocation4], %s356_s23, %s356_s23, %s357_s24  }
 0x1bb   :  { %351 = dma.done.wait [#allocation4], 256  }
 0x1bc   :  { %352 = vsyncadd [#allocation4], 4294967040 }
 0x1bd   :  { %285 = vsyncpa [#allocation4], 1 }

</bundles_post_ra>
